<compile_context>
chip_gen: v7x
topology: tpu7x:2x2x1
jax: 0.10.0
libtpu: 0.0.40
codegen_flags: <defaults>
</compile_context>

<pallas_src>
import functools

import jax
import jax.numpy as jnp
import numpy as np
from jax import lax
from jax.experimental import pallas as pl
from jax.experimental.pallas import tpu as pltpu


_VMEM_LIMIT = 48 * 1024 * 1024           # safe on v5e/v6e (128 MiB) and v7x (64 MiB)
_ROLL_PATH_MAX_SLAB = 8 * 1024 * 1024    # per-image input slab cap for the roll path


def _round_up(x, m):
    return (x + m - 1) // m * m


def _apply_activation(z, activation, a_scalar):
    if activation == 'prelu':
        z = jnp.where(z >= 0, z, a_scalar * z)
    elif activation == 'leakyrelu':
        z = jnp.where(z >= 0, z, 0.2 * z)
    elif activation == 'tanh':
        z = jnp.tanh(z)
    return z


def _smem_spec():
    # tiny per-layer scalar (PReLU slope) -> SMEM, no padded VMEM tile
    return pl.BlockSpec(memory_space=pltpu.MemorySpace.SMEM)


# --------------------- stride==1 "roll" kernels (no im2col) ---------------------- #

def _roll_conv_acc(w_ref, x_ref, K, Wp, Lout_pad):
    """Accumulate the K*K conv taps via lane rotations of the flattened input.

    x_ref: (Cin_p, L_pad) flattened padded image (flat index = row*Wp + col).
    Tap (ki, kj) of output flat position m reads x[m + ki*Wp + kj]; roll wrap-around
    only lands in the (sliced-away) horizontal / bottom padding columns.
    """
    x = x_ref[...]
    L_pad = x.shape[-1]
    acc = None
    for ki in range(K):
        for kj in range(K):
            s = ki * Wp + kj
            xt = x if s == 0 else pltpu.roll(x, L_pad - s, 1)
            part = jnp.dot(w_ref[ki * K + kj], xt[:, :Lout_pad],
                           preferred_element_type=jnp.float32)
            acc = part if acc is None else acc + part
    return acc                                            # (Cout_p, Lout_pad) f32


def _make_roll_fused_kernel(K, Wp, Lout_pad, activation):
    """conv + bias + activation fully fused (batch_norm=False)."""
    def kernel(w_ref, b_ref, a_ref, x_ref, o_ref):
        acc = _roll_conv_acc(w_ref, x_ref, K, Wp, Lout_pad)
        z = acc + b_ref[...]
        z = _apply_activation(z, activation, a_ref[0, 0])
        o_ref[...] = z.astype(o_ref.dtype)                # lane-dense store
    return kernel


def _make_roll_stats_kernel(K, Wp, Lout_pad):
    """conv (no bias -- it cancels in BN) + per-channel sum / sum-of-squares."""
    def kernel(w_ref, mask_ref, x_ref, y_ref, s1_ref, s2_ref):
        acc = _roll_conv_acc(w_ref, x_ref, K, Wp, Lout_pad)
        y_ref[...] = acc.astype(y_ref.dtype)
        yv = acc * mask_ref[...]                          # zero out pad columns
        s1_ref[...] = jnp.sum(yv, axis=1, keepdims=True)
        s2_ref[...] = jnp.sum(yv * yv, axis=1, keepdims=True)
    return kernel


# --------------------- im2col GEMM kernels (stride>1 fallback) ------------------- #

def _make_gemm_fused_kernel(activation):
    def kernel(w_ref, b_ref, a_ref, p_ref, o_ref):
        acc = jnp.dot(w_ref[...], p_ref[...], preferred_element_type=jnp.float32)
        z = acc + b_ref[...]
        z = _apply_activation(z, activation, a_ref[0, 0])
        o_ref[...] = z.astype(o_ref.dtype)
    return kernel


def _gemm_stats_kernel(w_ref, p_ref, y_ref, s1_ref, s2_ref):
    # no bias, no mask: zero-padded patch columns give exactly zero conv output
    j = pl.program_id(1)
    acc = jnp.dot(w_ref[...], p_ref[...], preferred_element_type=jnp.float32)
    y_ref[...] = acc.astype(y_ref.dtype)

    @pl.when(j == 0)
    def _init():
        s1_ref[...] = jnp.zeros_like(s1_ref)
        s2_ref[...] = jnp.zeros_like(s2_ref)

    s1_ref[...] += jnp.sum(acc, axis=1, keepdims=True)
    s2_ref[...] += jnp.sum(acc * acc, axis=1, keepdims=True)


# --------------------------- shared BN epilogue kernel --------------------------- #

def _make_affine_act_kernel(activation):
    """per-channel affine (folded BatchNorm) + activation, single read of y."""
    def kernel(scale_ref, shift_ref, a_ref, y_ref, o_ref):
        z = y_ref[...].astype(jnp.float32) * scale_ref[...] + shift_ref[...]
        z = _apply_activation(z, activation, a_ref[0, 0])
        o_ref[...] = z.astype(o_ref.dtype)
    return kernel


# ----------------------------------- paths --------------------------------------- #

def _conv_roll_path(x_flat, wt, b2, a2, mask, *, K, Wp, L_pad, Lout_pad,
                    batch_norm, activation, compute_dtype):
    N, Cin_p, _ = x_flat.shape
    KK, Cout_p, _ = wt.shape

    w_spec = pl.BlockSpec((KK, Cout_p, Cin_p), lambda n: (0, 0, 0))
    b_spec = pl.BlockSpec((Cout_p, 1), lambda n: (0, 0))
    x_spec = pl.BlockSpec((None, Cin_p, L_pad), lambda n: (n, 0, 0))
    y_spec = pl.BlockSpec((None, Cout_p, Lout_pad), lambda n: (n, 0, 0))
    s_spec = pl.BlockSpec((None, Cout_p, 1), lambda n: (n, 0, 0))
    m_spec = pl.BlockSpec((1, Lout_pad), lambda n: (0, 0))
    cp = pltpu.CompilerParams(dimension_semantics=("parallel",),
                              vmem_limit_bytes=_VMEM_LIMIT)

    if not batch_norm:
        out = pl.pallas_call(
            _make_roll_fused_kernel(K, Wp, Lout_pad, activation),
            out_shape=jax.ShapeDtypeStruct((N, Cout_p, Lout_pad), jnp.float32),
            grid=(N,),
            in_specs=[w_spec, b_spec, _smem_spec(), x_spec],
            out_specs=y_spec,
            compiler_params=cp,
        )(wt, b2, a2, x_flat)
        return out, None, None

    y, s1, s2 = pl.pallas_call(
        _make_roll_stats_kernel(K, Wp, Lout_pad),
        out_shape=(jax.ShapeDtypeStruct((N, Cout_p, Lout_pad), compute_dtype),
                   jax.ShapeDtypeStruct((N, Cout_p, 1), jnp.float32),
                   jax.ShapeDtypeStruct((N, Cout_p, 1), jnp.float32)),
        grid=(N,),
        in_specs=[w_spec, m_spec, x_spec],
        out_specs=(y_spec, s_spec, s_spec),
        compiler_params=cp,
    )(wt, mask, x_flat)
    return y, s1, s2


def _conv_gemm_path(patches, w2, b2, a2, *, TM, batch_norm, activation, compute_dtype):
    N, Kc_p, HW_pad = patches.shape
    Cout_p = w2.shape[0]
    grid = (N, HW_pad // TM)

    w_spec = pl.BlockSpec((Cout_p, Kc_p), lambda n, j: (0, 0))
    b_spec = pl.BlockSpec((Cout_p, 1), lambda n, j: (0, 0))
    p_spec = pl.BlockSpec((None, Kc_p, TM), lambda n, j: (n, 0, j))
    y_spec = pl.BlockSpec((None, Cout_p, TM), lambda n, j: (n, 0, j))
    s_spec = pl.BlockSpec((None, Cout_p, 1), lambda n, j: (n, 0, 0))

    if not batch_norm:
        out = pl.pallas_call(
            _make_gemm_fused_kernel(activation),
            out_shape=jax.ShapeDtypeStruct((N, Cout_p, HW_pad), jnp.float32),
            grid=grid,
            in_specs=[w_spec, b_spec, _smem_spec(), p_spec],
            out_specs=y_spec,
            compiler_params=pltpu.CompilerParams(
                dimension_semantics=("parallel", "parallel"),
                vmem_limit_bytes=_VMEM_LIMIT),
        )(w2, b2, a2, patches)
        return out, None, None

    y, s1, s2 = pl.pallas_call(
        _gemm_stats_kernel,
        out_shape=(jax.ShapeDtypeStruct((N, Cout_p, HW_pad), compute_dtype),
                   jax.ShapeDtypeStruct((N, Cout_p, 1), jnp.float32),
                   jax.ShapeDtypeStruct((N, Cout_p, 1), jnp.float32)),
        grid=grid,
        in_specs=[w_spec, p_spec],
        out_specs=(y_spec, s_spec, s_spec),
        compiler_params=pltpu.CompilerParams(
            # HW-tile axis accumulates the stats outputs -> must be "arbitrary"
            dimension_semantics=("parallel", "arbitrary"),
            vmem_limit_bytes=_VMEM_LIMIT),
    )(w2, patches)
    return y, s1, s2


def _affine_act_pass(y, scale2, shift2, a2, activation):
    N, Cout_p, Lw = y.shape
    blk = pl.BlockSpec((None, Cout_p, Lw), lambda n: (n, 0, 0))
    return pl.pallas_call(
        _make_affine_act_kernel(activation),
        out_shape=jax.ShapeDtypeStruct((N, Cout_p, Lw), jnp.float32),
        grid=(N,),
        in_specs=[pl.BlockSpec((Cout_p, 1), lambda n: (0, 0)),
                  pl.BlockSpec((Cout_p, 1), lambda n: (0, 0)),
                  _smem_spec(),
                  blk],
        out_specs=blk,
        compiler_params=pltpu.CompilerParams(
            dimension_semantics=("parallel",),
            vmem_limit_bytes=_VMEM_LIMIT),
    )(scale2, shift2, a2, y)


# ----------------------------------- wrapper -------------------------------------- #

def conv_block_forward(x_nchw, params, *, kernel_size, stride=1,
                       batch_norm=False, activation=None,
                       block_m=1024, compute_dtype=jnp.bfloat16):
    """Pallas implementation of ConvolutionalBlock.forward (NCHW in / NCHW out)."""
    if activation is not None:
        activation = activation.lower()
        assert activation in {'prelu', 'leakyrelu', 'tanh'}

    K = kernel_size
    pad = K // 2
    w = params['w'].astype(jnp.float32)        # (K, K, Cin, Cout)
    b = params['b'].astype(jnp.float32)        # (Cout,)
    Cout = w.shape[-1]

    x = x_nchw.astype(jnp.float32)             # NCHW, no layout transposes
    N, Cin, H, W_ = x.shape
    Ho = (H + 2 * pad - K) // stride + 1
    Wo = (W_ + 2 * pad - K) // stride + 1

    sub = 16 if compute_dtype == jnp.bfloat16 else 8
    Cin_p = _round_up(Cin, sub)
    Cout_p = _round_up(Cout, 8)

    a2 = jnp.asarray(params.get('prelu_a', 0.25), jnp.float32).reshape(1, 1)
    b2 = jnp.pad(b, (0, Cout_p - Cout)).reshape(Cout_p, 1)

    itemsize = jnp.dtype(compute_dtype).itemsize
    Hp, Wp = H + 2 * pad, W_ + 2 * pad
    L_pad = _round_up(Hp * Wp, 128)
    use_roll = (stride == 1) and (Cin_p * L_pad * itemsize <= _ROLL_PATH_MAX_SLAB)

    if use_roll:
        # ---- stride-1 path: no im2col, taps synthesized in-kernel via lane rolls ----
        Lout_pad = _round_up(Ho * Wp, 128)
        x_pad = jnp.pad(x, ((0, 0), (0, 0), (pad, pad), (pad, pad)))
        x_flat = x_pad.reshape(N, Cin, Hp * Wp)
        x_flat = jnp.pad(x_flat, ((0, 0), (0, Cin_p - Cin),
                                  (0, L_pad - Hp * Wp))).astype(compute_dtype)
        # per-tap weight matrices: wt[ki*K+kj, co, ci] = w[ki, kj, ci, co]
        wt = jnp.transpose(w, (0, 1, 3, 2)).reshape(K * K, Cout, Cin)
        wt = jnp.pad(wt, ((0, 0), (0, Cout_p - Cout),
                          (0, Cin_p - Cin))).astype(compute_dtype)
        # validity mask over the flattened output (pad columns carry garbage)
        m = jnp.arange(Lout_pad, dtype=jnp.int32)
        mask = ((m < Ho * Wp) & ((m % Wp) < Wo)).astype(jnp.float32).reshape(1, Lout_pad)

        res, s1, s2 = _conv_roll_path(
            x_flat, wt, b2, a2, mask, K=K, Wp=Wp, L_pad=L_pad, Lout_pad=Lout_pad,
            batch_norm=batch_norm, activation=activation, compute_dtype=compute_dtype)

        def extract(z):
            return z[:, :Cout, :Ho * Wp].reshape(N, Cout, Ho, Wp)[..., :Wo]
    else:
        # ---- strided / oversized fallback: tiled im2col GEMM ----
        HW = Ho * Wo
        Kc = K * K * Cin
        Kc_p = _round_up(Kc, sub)
        x_pad = jnp.pad(x, ((0, 0), (0, 0), (pad, pad), (pad, pad)))
        taps = [x_pad[:, :, ki:ki + (Ho - 1) * stride + 1:stride,
                      kj:kj + (Wo - 1) * stride + 1:stride]
                for ki in range(K) for kj in range(K)]
        patches = jnp.stack(taps, axis=1).reshape(N, Kc, HW)
        TM = _round_up(min(block_m, _round_up(HW, 128)), 128)
        HW_pad = _round_up(HW, TM)
        patches = jnp.pad(patches, ((0, 0), (0, Kc_p - Kc),
                                    (0, HW_pad - HW))).astype(compute_dtype)
        w2 = jnp.transpose(w, (3, 0, 1, 2)).reshape(Cout, Kc)
        w2 = jnp.pad(w2, ((0, Cout_p - Cout), (0, Kc_p - Kc))).astype(compute_dtype)

        res, s1, s2 = _conv_gemm_path(
            patches, w2, b2, a2, TM=TM, batch_norm=batch_norm,
            activation=activation, compute_dtype=compute_dtype)

        def extract(z):
            return z[:, :Cout, :HW].reshape(N, Cout, Ho, Wo)

    if not batch_norm:
        return extract(res)

    # fold nn.BatchNorm2d (training-mode batch stats, biased variance, eps=1e-5);
    # the conv bias is omitted from the stats pass -- it cancels against the mean.
    count = jnp.float32(N * Ho * Wo)
    mean = jnp.sum(s1[:, :Cout, 0], axis=0) / count
    msq = jnp.sum(s2[:, :Cout, 0], axis=0) / count
    var = jnp.maximum(msq - mean * mean, 0.0)   # TODO(synk): Welford/shifted accumulation
    gamma = params['gamma'].astype(jnp.float32)
    beta = params['beta'].astype(jnp.float32)
    scale = gamma * lax.rsqrt(var + 1e-5)
    shift = beta - mean * scale
    scale2 = jnp.pad(scale, (0, Cout_p - Cout)).reshape(Cout_p, 1)
    shift2 = jnp.pad(shift, (0, Cout_p - Cout)).reshape(Cout_p, 1)

    out = _affine_act_pass(res, scale2, shift2, a2, activation)
    return extract(out)


# ------------------------------- pure-JAX reference -------------------------------- #

def conv_block_reference(x_nchw, params, *, kernel_size, stride=1,
                         batch_norm=False, activation=None):
    w = params['w']   # (K, K, Cin, Cout)
    b = params['b']
    pad = kernel_size // 2
    w_oihw = jnp.transpose(w, (3, 2, 0, 1))
    y = lax.conv_general_dilated(
        x_nchw.astype(jnp.float32), w_oihw,
        window_strides=(stride, stride),
        padding=[(pad, pad), (pad, pad)],
        dimension_numbers=('NCHW', 'OIHW', 'NCHW'))
    y = y + b.reshape(1, -1, 1, 1)
    if batch_norm:
        mean = jnp.mean(y, axis=(0, 2, 3), keepdims=True)
        var = jnp.var(y, axis=(0, 2, 3), keepdims=True)
        y = (y - mean) * lax.rsqrt(var + 1e-5)
        y = y * params['gamma'].reshape(1, -1, 1, 1) + params['beta'].reshape(1, -1, 1, 1)
    if activation == 'prelu':
        y = jnp.where(y >= 0, y, params['prelu_a'] * y)
    elif activation == 'leakyrelu':
        y = jnp.where(y >= 0, y, 0.2 * y)
    elif activation == 'tanh':
        y = jnp.tanh(y)
    return y


# -------------------------------------- main --------------------------------------- #

if __name__ == "__main__":
    key = jax.random.PRNGKey(0)

    configs = [
        # SRResNet residual conv: 3x3 + BN + PReLU (roll path, f32 tight check)
        dict(cin=4, cout=8, k=3, stride=1, bn=True,  act='prelu',     hw=16,
             dtype=jnp.float32,  block_m=1024, tol=1e-4),
        # same block with the default bf16 compute path (looser tolerance)
        dict(cin=4, cout=8, k=3, stride=1, bn=True,  act='prelu',     hw=16,
             dtype=jnp.bfloat16, block_m=1024, tol=3e-2),
        # discriminator-style strided conv + LeakyReLU (im2col path, bf16)
        dict(cin=4, cout=8, k=3, stride=2, bn=False, act='leakyrelu', hw=16,
             dtype=jnp.bfloat16, block_m=1024, tol=3e-2),
        # strided conv + BN (im2col path, multi-tile stats accumulation, f32)
        dict(cin=4, cout=8, k=3, stride=2, bn=True,  act='leakyrelu', hw=32,
             dtype=jnp.float32,  block_m=128,  tol=1e-4),
        # SRGAN large-kernel output conv: 9x9 + Tanh (roll path, bf16)
        dict(cin=4, cout=8, k=9, stride=1, bn=False, act='tanh',      hw=16,
             dtype=jnp.bfloat16, block_m=1024, tol=3e-2),
    ]

    for cfg in configs:
        key, kx, kw, kb = jax.random.split(key, 4)
        cin, cout, k = cfg['cin'], cfg['cout'], cfg['k']
        fan_in = cin * k * k
        bound = 1.0 / np.sqrt(fan_in)
        params = {
            'w': jax.random.uniform(kw, (k, k, cin, cout), jnp.float32, -bound, bound),
            'b': jax.random.uniform(kb, (cout,), jnp.float32, -bound, bound),
            'gamma': jnp.ones((cout,), jnp.float32),
            'beta': jnp.zeros((cout,), jnp.float32),
            'prelu_a': jnp.float32(0.25),
        }
        x = jax.random.normal(kx, (2, cin, cfg['hw'], cfg['hw']), jnp.float32)  # NCHW

        fwd = functools.partial(conv_block_forward, kernel_size=k,
                                stride=cfg['stride'], batch_norm=cfg['bn'],
                                activation=cfg['act'], block_m=cfg['block_m'],
                                compute_dtype=cfg['dtype'])
        out = jax.jit(fwd)(x, params)
        out = jax.block_until_ready(out)

        ref = conv_block_reference(x, params, kernel_size=k, stride=cfg['stride'],
                                   batch_norm=cfg['bn'], activation=cfg['act'])
        assert out.shape == ref.shape, (out.shape, ref.shape)
        np.testing.assert_allclose(np.asarray(out), np.asarray(ref),
                                   rtol=cfg['tol'], atol=cfg['tol'])

    print("KERNEL_OK")
</pallas_src>

<mosaic_0001>
module attributes {stable_mosaic.version = 11 : i64} {
  func.func @kernel(%arg0: i32, %arg1: memref<8x1xf32, #tpu.memory_space<vmem>>, %arg2: memref<8x1xf32, #tpu.memory_space<vmem>>, %arg3: memref<1x1xf32, #tpu.memory_space<smem>>, %arg4: memref<1x8x384xf32, #tpu.memory_space<vmem>>, %arg5: memref<1x8x384xf32, #tpu.memory_space<vmem>>) attributes {dimension_semantics = [#tpu.dimension_semantics<parallel>], iteration_bounds = array<i64: 2>, scalar_prefetch = 0 : i64, scratch_operands = 0 : i64, tpu.core_type = #tpu.core_type<tc>, window_params = [{pipeline_mode = #tpu.pipeline_mode<synchronous>, transform_indices = @transform_0, window_bounds = array<i64: 8, 1>}, {pipeline_mode = #tpu.pipeline_mode<synchronous>, transform_indices = @transform_1, window_bounds = array<i64: 8, 1>}, {transform_indices = @transform_2, window_bounds = array<i64: 1, 1>}, {transform_indices = @transform_3, window_bounds = array<i64: 1, 8, 384>}, {transform_indices = @transform_4, window_bounds = array<i64: 1, 8, 384>}]} {
    %c0 = arith.constant 0 : index
    %c0_0 = arith.constant 0 : index
    %c0_1 = arith.constant 0 : index
    %0 = vector.load %arg4[%c0, %c0_0, %c0_1] : memref<1x8x384xf32, #tpu.memory_space<vmem>>, vector<1x8x384xf32>
    %1 = vector.shape_cast %0 : vector<1x8x384xf32> to vector<8x384xf32>
    %c0_2 = arith.constant 0 : index
    %c0_3 = arith.constant 0 : index
    %2 = vector.load %arg1[%c0_2, %c0_3] : memref<8x1xf32, #tpu.memory_space<vmem>>, vector<8x1xf32>
    %3 = vector.broadcast %2 : vector<8x1xf32> to vector<8x384xf32>
    %4 = arith.mulf %1, %3 : vector<8x384xf32>
    %c0_4 = arith.constant 0 : index
    %c0_5 = arith.constant 0 : index
    %5 = vector.load %arg2[%c0_4, %c0_5] : memref<8x1xf32, #tpu.memory_space<vmem>>, vector<8x1xf32>
    %6 = vector.broadcast %5 : vector<8x1xf32> to vector<8x384xf32>
    %7 = arith.addf %4, %6 : vector<8x384xf32>
    %c0_6 = arith.constant 0 : index
    %c0_7 = arith.constant 0 : index
    %8 = memref.load %arg3[%c0_6, %c0_7] : memref<1x1xf32, #tpu.memory_space<smem>>
    %cst = arith.constant 0.000000e+00 : f32
    %9 = vector.broadcast %cst : f32 to vector<8x384xf32>
    %10 = arith.cmpf oge, %7, %9 : vector<8x384xf32>
    %11 = vector.broadcast %8 : f32 to vector<8x384xf32>
    %12 = arith.mulf %11, %7 : vector<8x384xf32>
    %13 = arith.select %10, %7, %12 : vector<8x384xi1>, vector<8x384xf32>
    %c0_8 = arith.constant 0 : index
    %c0_9 = arith.constant 0 : index
    %c0_10 = arith.constant 0 : index
    %14 = vector.load %arg5[%c0_8, %c0_9, %c0_10] : memref<1x8x384xf32, #tpu.memory_space<vmem>>, vector<1x8x384xf32>
    %15 = vector.shape_cast %14 : vector<1x8x384xf32> to vector<8x384xf32>
    %16 = vector.shape_cast %13 : vector<8x384xf32> to vector<1x8x384xf32>
    tpu.vector_store %arg5[%c0_8, %c0_9, %c0_10], %16 {strides = array<i32>} : memref<1x8x384xf32, #tpu.memory_space<vmem>>, vector<1x8x384xf32>,
    return
  }
  func.func @transform_0(%arg0: i32) -> (i32, i32) {
    %c0_i32 = arith.constant 0 : i32
    %c0_i32_0 = arith.constant 0 : i32
    %c0_i32_1 = arith.constant 0 : i32
    return %c0_i32, %c0_i32_0 : i32, i32
  }
  func.func @transform_1(%arg0: i32) -> (i32, i32) {
    %c0_i32 = arith.constant 0 : i32
    %c0_i32_0 = arith.constant 0 : i32
    %c0_i32_1 = arith.constant 0 : i32
    return %c0_i32, %c0_i32_0 : i32, i32
  }
  func.func @transform_2(%arg0: i32) -> (i32, i32) {
    %c0_i32 = arith.constant 0 : i32
    %c0_i32_0 = arith.constant 0 : i32
    %c0_i32_1 = arith.constant 0 : i32
    return %c0_i32, %c0_i32_0 : i32, i32
  }
  func.func @transform_3(%arg0: i32) -> (i32, i32, i32) {
    %c0_i32 = arith.constant 0 : i32
    %c0_i32_0 = arith.constant 0 : i32
    %c0_i32_1 = arith.constant 0 : i32
    return %arg0, %c0_i32, %c0_i32_0 : i32, i32, i32
  }
  func.func @transform_4(%arg0: i32) -> (i32, i32, i32) {
    %c0_i32 = arith.constant 0 : i32
    %c0_i32_0 = arith.constant 0 : i32
    %c0_i32_1 = arith.constant 0 : i32
    return %arg0, %c0_i32, %c0_i32_0 : i32, i32, i32
  }
}

module attributes {stable_mosaic.version = 11 : i64} {
  func.func @kernel(%arg0: i32, %arg1: memref<9x8x8xf32, #tpu.memory_space<vmem>>, %arg2: memref<1x384xf32, #tpu.memory_space<vmem>>, %arg3: memref<1x8x384xf32, #tpu.memory_space<vmem>>, %arg4: memref<1x8x384xf32, #tpu.memory_space<vmem>>, %arg5: memref<1x8x1xf32, #tpu.memory_space<vmem>>, %arg6: memref<1x8x1xf32, #tpu.memory_space<vmem>>) attributes {dimension_semantics = [#tpu.dimension_semantics<parallel>], iteration_bounds = array<i64: 2>, scalar_prefetch = 0 : i64, scratch_operands = 0 : i64, tpu.core_type = #tpu.core_type<tc>, window_params = [{pipeline_mode = #tpu.pipeline_mode<synchronous>, transform_indices = @transform_0, window_bounds = array<i64: 9, 8, 8>}, {pipeline_mode = #tpu.pipeline_mode<synchronous>, transform_indices = @transform_1, window_bounds = array<i64: 1, 384>}, {transform_indices = @transform_2, window_bounds = array<i64: 1, 8, 384>}, {transform_indices = @transform_3, window_bounds = array<i64: 1, 8, 384>}, {transform_indices = @transform_4, window_bounds = array<i64: 1, 8, 1>}, {transform_indices = @transform_5, window_bounds = array<i64: 1, 8, 1>}]} {
    %c0 = arith.constant 0 : index
    %c0_0 = arith.constant 0 : index
    %c0_1 = arith.constant 0 : index
    %0 = vector.load %arg3[%c0, %c0_0, %c0_1] : memref<1x8x384xf32, #tpu.memory_space<vmem>>, vector<1x8x384xf32>
    %1 = vector.shape_cast %0 : vector<1x8x384xf32> to vector<8x384xf32>
    %c0_2 = arith.constant 0 : index
    %c0_3 = arith.constant 0 : index
    %c0_4 = arith.constant 0 : index
    %2 = vector.load %arg1[%c0_2, %c0_3, %c0_4] : memref<9x8x8xf32, #tpu.memory_space<vmem>>, vector<1x8x8xf32>
    %3 = vector.shape_cast %2 : vector<1x8x8xf32> to vector<8x8xf32>
    %cst = arith.constant dense<0.000000e+00> : vector<8x384xf32>
    %4 = tpu.matmul %3, %1, %cst {dimension_numbers = #tpu.dot_dimension_numbers<[1], [0], [0], [1], [0, 0, 1, 1], [], []>} : vector<8x8xf32>, vector<8x384xf32>, vector<8x384xf32> -> vector<8x384xf32>
    %c383_i32 = arith.constant 383 : i32
    %5 = tpu.dynamic_rotate %1 by %c383_i32 dim 1 : vector<8x384xf32>, i32 -> vector<8x384xf32>
    %c1 = arith.constant 1 : index
    %c0_5 = arith.constant 0 : index
    %c0_6 = arith.constant 0 : index
    %6 = vector.load %arg1[%c1, %c0_5, %c0_6] : memref<9x8x8xf32, #tpu.memory_space<vmem>>, vector<1x8x8xf32>
    %7 = vector.shape_cast %6 : vector<1x8x8xf32> to vector<8x8xf32>
    %cst_7 = arith.constant dense<0.000000e+00> : vector<8x384xf32>
    %8 = tpu.matmul %7, %5, %cst_7 {dimension_numbers = #tpu.dot_dimension_numbers<[1], [0], [0], [1], [0, 0, 1, 1], [], []>} : vector<8x8xf32>, vector<8x384xf32>, vector<8x384xf32> -> vector<8x384xf32>
    %9 = arith.addf %4, %8 : vector<8x384xf32>
    %c382_i32 = arith.constant 382 : i32
    %10 = tpu.dynamic_rotate %1 by %c382_i32 dim 1 : vector<8x384xf32>, i32 -> vector<8x384xf32>
    %c2 = arith.constant 2 : index
    %c0_8 = arith.constant 0 : index
    %c0_9 = arith.constant 0 : index
    %11 = vector.load %arg1[%c2, %c0_8, %c0_9] : memref<9x8x8xf32, #tpu.memory_space<vmem>>, vector<1x8x8xf32>
    %12 = vector.shape_cast %11 : vector<1x8x8xf32> to vector<8x8xf32>
    %cst_10 = arith.constant dense<0.000000e+00> : vector<8x384xf32>
    %13 = tpu.matmul %12, %10, %cst_10 {dimension_numbers = #tpu.dot_dimension_numbers<[1], [0], [0], [1], [0, 0, 1, 1], [], []>} : vector<8x8xf32>, vector<8x384xf32>, vector<8x384xf32> -> vector<8x384xf32>
    %14 = arith.addf %9, %13 : vector<8x384xf32>
    %c366_i32 = arith.constant 366 : i32
    %15 = tpu.dynamic_rotate %1 by %c366_i32 dim 1 : vector<8x384xf32>, i32 -> vector<8x384xf32>
    %c3 = arith.constant 3 : index
    %c0_11 = arith.constant 0 : index
    %c0_12 = arith.constant 0 : index
    %16 = vector.load %arg1[%c3, %c0_11, %c0_12] : memref<9x8x8xf32, #tpu.memory_space<vmem>>, vector<1x8x8xf32>
    %17 = vector.shape_cast %16 : vector<1x8x8xf32> to vector<8x8xf32>
    %cst_13 = arith.constant dense<0.000000e+00> : vector<8x384xf32>
    %18 = tpu.matmul %17, %15, %cst_13 {dimension_numbers = #tpu.dot_dimension_numbers<[1], [0], [0], [1], [0, 0, 1, 1], [], []>} : vector<8x8xf32>, vector<8x384xf32>, vector<8x384xf32> -> vector<8x384xf32>
    %19 = arith.addf %14, %18 : vector<8x384xf32>
    %c365_i32 = arith.constant 365 : i32
    %20 = tpu.dynamic_rotate %1 by %c365_i32 dim 1 : vector<8x384xf32>, i32 -> vector<8x384xf32>
    %c4 = arith.constant 4 : index
    %c0_14 = arith.constant 0 : index
    %c0_15 = arith.constant 0 : index
    %21 = vector.load %arg1[%c4, %c0_14, %c0_15] : memref<9x8x8xf32, #tpu.memory_space<vmem>>, vector<1x8x8xf32>
    %22 = vector.shape_cast %21 : vector<1x8x8xf32> to vector<8x8xf32>
    %cst_16 = arith.constant dense<0.000000e+00> : vector<8x384xf32>
    %23 = tpu.matmul %22, %20, %cst_16 {dimension_numbers = #tpu.dot_dimension_numbers<[1], [0], [0], [1], [0, 0, 1, 1], [], []>} : vector<8x8xf32>, vector<8x384xf32>, vector<8x384xf32> -> vector<8x384xf32>
    %24 = arith.addf %19, %23 : vector<8x384xf32>
    %c364_i32 = arith.constant 364 : i32
    %25 = tpu.dynamic_rotate %1 by %c364_i32 dim 1 : vector<8x384xf32>, i32 -> vector<8x384xf32>
    %c5 = arith.constant 5 : index
    %c0_17 = arith.constant 0 : index
    %c0_18 = arith.constant 0 : index
    %26 = vector.load %arg1[%c5, %c0_17, %c0_18] : memref<9x8x8xf32, #tpu.memory_space<vmem>>, vector<1x8x8xf32>
    %27 = vector.shape_cast %26 : vector<1x8x8xf32> to vector<8x8xf32>
    %cst_19 = arith.constant dense<0.000000e+00> : vector<8x384xf32>
    %28 = tpu.matmul %27, %25, %cst_19 {dimension_numbers = #tpu.dot_dimension_numbers<[1], [0], [0], [1], [0, 0, 1, 1], [], []>} : vector<8x8xf32>, vector<8x384xf32>, vector<8x384xf32> -> vector<8x384xf32>
    %29 = arith.addf %24, %28 : vector<8x384xf32>
    %c348_i32 = arith.constant 348 : i32
    %30 = tpu.dynamic_rotate %1 by %c348_i32 dim 1 : vector<8x384xf32>, i32 -> vector<8x384xf32>
    %c6 = arith.constant 6 : index
    %c0_20 = arith.constant 0 : index
    %c0_21 = arith.constant 0 : index
    %31 = vector.load %arg1[%c6, %c0_20, %c0_21] : memref<9x8x8xf32, #tpu.memory_space<vmem>>, vector<1x8x8xf32>
    %32 = vector.shape_cast %31 : vector<1x8x8xf32> to vector<8x8xf32>
    %cst_22 = arith.constant dense<0.000000e+00> : vector<8x384xf32>
    %33 = tpu.matmul %32, %30, %cst_22 {dimension_numbers = #tpu.dot_dimension_numbers<[1], [0], [0], [1], [0, 0, 1, 1], [], []>} : vector<8x8xf32>, vector<8x384xf32>, vector<8x384xf32> -> vector<8x384xf32>
    %34 = arith.addf %29, %33 : vector<8x384xf32>
    %c347_i32 = arith.constant 347 : i32
    %35 = tpu.dynamic_rotate %1 by %c347_i32 dim 1 : vector<8x384xf32>, i32 -> vector<8x384xf32>
    %c7 = arith.constant 7 : index
    %c0_23 = arith.constant 0 : index
    %c0_24 = arith.constant 0 : index
    %36 = vector.load %arg1[%c7, %c0_23, %c0_24] : memref<9x8x8xf32, #tpu.memory_space<vmem>>, vector<1x8x8xf32>
    %37 = vector.shape_cast %36 : vector<1x8x8xf32> to vector<8x8xf32>
    %cst_25 = arith.constant dense<0.000000e+00> : vector<8x384xf32>
    %38 = tpu.matmul %37, %35, %cst_25 {dimension_numbers = #tpu.dot_dimension_numbers<[1], [0], [0], [1], [0, 0, 1, 1], [], []>} : vector<8x8xf32>, vector<8x384xf32>, vector<8x384xf32> -> vector<8x384xf32>
    %39 = arith.addf %34, %38 : vector<8x384xf32>
    %c346_i32 = arith.constant 346 : i32
    %40 = tpu.dynamic_rotate %1 by %c346_i32 dim 1 : vector<8x384xf32>, i32 -> vector<8x384xf32>
    %c8 = arith.constant 8 : index
    %c0_26 = arith.constant 0 : index
    %c0_27 = arith.constant 0 : index
    %41 = vector.load %arg1[%c8, %c0_26, %c0_27] : memref<9x8x8xf32, #tpu.memory_space<vmem>>, vector<1x8x8xf32>
    %42 = vector.shape_cast %41 : vector<1x8x8xf32> to vector<8x8xf32>
    %cst_28 = arith.constant dense<0.000000e+00> : vector<8x384xf32>
    %43 = tpu.matmul %42, %40, %cst_28 {dimension_numbers = #tpu.dot_dimension_numbers<[1], [0], [0], [1], [0, 0, 1, 1], [], []>} : vector<8x8xf32>, vector<8x384xf32>, vector<8x384xf32> -> vector<8x384xf32>
    %44 = arith.addf %39, %43 : vector<8x384xf32>
    %c0_29 = arith.constant 0 : index
    %c0_30 = arith.constant 0 : index
    %c0_31 = arith.constant 0 : index
    %45 = vector.load %arg4[%c0_29, %c0_30, %c0_31] : memref<1x8x384xf32, #tpu.memory_space<vmem>>, vector<1x8x384xf32>
    %46 = vector.shape_cast %45 : vector<1x8x384xf32> to vector<8x384xf32>
    %47 = vector.shape_cast %44 : vector<8x384xf32> to vector<1x8x384xf32>
    tpu.vector_store %arg4[%c0_29, %c0_30, %c0_31], %47 {strides = array<i32>} : memref<1x8x384xf32, #tpu.memory_space<vmem>>, vector<1x8x384xf32>,
    %c0_32 = arith.constant 0 : index
    %c0_33 = arith.constant 0 : index
    %48 = vector.load %arg2[%c0_32, %c0_33] : memref<1x384xf32, #tpu.memory_space<vmem>>, vector<1x384xf32>
    %49 = vector.broadcast %48 : vector<1x384xf32> to vector<8x384xf32>
    %50 = arith.mulf %44, %49 : vector<8x384xf32>
    %cst_34 = arith.constant dense<0.000000e+00> : vector<8xf32>
    %51 = vector.multi_reduction <add>, %50, %cst_34 [1] : vector<8x384xf32> to vector<8xf32>
    %52 = vector.shape_cast %51 : vector<8xf32> to vector<8x1xf32>
    %c0_35 = arith.constant 0 : index
    %c0_36 = arith.constant 0 : index
    %c0_37 = arith.constant 0 : index
    %53 = vector.load %arg5[%c0_35, %c0_36, %c0_37] : memref<1x8x1xf32, #tpu.memory_space<vmem>>, vector<1x8x1xf32>
    %54 = vector.shape_cast %53 : vector<1x8x1xf32> to vector<8x1xf32>
    %55 = vector.shape_cast %52 : vector<8x1xf32> to vector<1x8x1xf32>
    tpu.vector_store %arg5[%c0_35, %c0_36, %c0_37], %55 {strides = array<i32>} : memref<1x8x1xf32, #tpu.memory_space<vmem>>, vector<1x8x1xf32>,
    %56 = arith.mulf %50, %50 : vector<8x384xf32>
    %cst_38 = arith.constant dense<0.000000e+00> : vector<8xf32>
    %57 = vector.multi_reduction <add>, %56, %cst_38 [1] : vector<8x384xf32> to vector<8xf32>
    %58 = vector.shape_cast %57 : vector<8xf32> to vector<8x1xf32>
    %c0_39 = arith.constant 0 : index
    %c0_40 = arith.constant 0 : index
    %c0_41 = arith.constant 0 : index
    %59 = vector.load %arg6[%c0_39, %c0_40, %c0_41] : memref<1x8x1xf32, #tpu.memory_space<vmem>>, vector<1x8x1xf32>
    %60 = vector.shape_cast %59 : vector<1x8x1xf32> to vector<8x1xf32>
    %61 = vector.shape_cast %58 : vector<8x1xf32> to vector<1x8x1xf32>
    tpu.vector_store %arg6[%c0_39, %c0_40, %c0_41], %61 {strides = array<i32>} : memref<1x8x1xf32, #tpu.memory_space<vmem>>, vector<1x8x1xf32>,
    return
  }
  func.func @transform_0(%arg0: i32) -> (i32, i32, i32) {
    %c0_i32 = arith.constant 0 : i32
    %c0_i32_0 = arith.constant 0 : i32
    %c0_i32_1 = arith.constant 0 : i32
    %c0_i32_2 = arith.constant 0 : i32
    return %c0_i32, %c0_i32_0, %c0_i32_1 : i32, i32, i32
  }
  func.func @transform_1(%arg0: i32) -> (i32, i32) {
    %c0_i32 = arith.constant 0 : i32
    %c0_i32_0 = arith.constant 0 : i32
    %c0_i32_1 = arith.constant 0 : i32
    return %c0_i32, %c0_i32_0 : i32, i32
  }
  func.func @transform_2(%arg0: i32) -> (i32, i32, i32) {
    %c0_i32 = arith.constant 0 : i32
    %c0_i32_0 = arith.constant 0 : i32
    %c0_i32_1 = arith.constant 0 : i32
    return %arg0, %c0_i32, %c0_i32_0 : i32, i32, i32
  }
  func.func @transform_3(%arg0: i32) -> (i32, i32, i32) {
    %c0_i32 = arith.constant 0 : i32
    %c0_i32_0 = arith.constant 0 : i32
    %c0_i32_1 = arith.constant 0 : i32
    return %arg0, %c0_i32, %c0_i32_0 : i32, i32, i32
  }
  func.func @transform_4(%arg0: i32) -> (i32, i32, i32) {
    %c0_i32 = arith.constant 0 : i32
    %c0_i32_0 = arith.constant 0 : i32
    %c0_i32_1 = arith.constant 0 : i32
    return %arg0, %c0_i32, %c0_i32_0 : i32, i32, i32
  }
  func.func @transform_5(%arg0: i32) -> (i32, i32, i32) {
    %c0_i32 = arith.constant 0 : i32
    %c0_i32_0 = arith.constant 0 : i32
    %c0_i32_1 = arith.constant 0 : i32
    return %arg0, %c0_i32, %c0_i32_0 : i32, i32, i32
  }
}

</mosaic_0001>

<bundles_post_ra>
// kernel: conv_block_forward.3
= control target key start
LH: loop header
LB: loop body
LE: loop exit
PB: predicated region body
PF: predicated region fallthrough
CT: control target
= control target key end

     0   :  { %s346_s17 = smov 0   ;;  %s369_s0 = inlined_call_operand.vmem [shape: f32[8,1], index: 0, kind: input, shape index: {}]   ;;  %s370_s1 = inlined_call_operand.vmem [shape: f32[8,1], index: 1, kind: input, shape index: {}]   ;;  %s371_s2 = inlined_call_operand.<no memory space> [shape: f32[1,1], index: 2, kind: input, shape index: {}]   ;;  %s372_s3 = inlined_call_operand.vmem [shape: f32[2,8,384], index: 3, kind: input, shape index: {}]   ;;  %s373_s4 = inlined_call_operand.vmem [shape: f32[2,8,384], index: 4, kind: output, shape index: {}]  }
   0x1   :  { %9 = sst [smem:[#allocation2]] %s371_s2 }
   0x2 LB: > { %s289_s18 = sadd.s32 4294967295, %s315_s17   ;;  %p293_p0 = scmp.ge.s32.totalorder %s315_s17, 1  ;;  %s315_s17 = sphi %s346_s17, %s15_s17  }
   0x3   : > { %p163_p1 = scmp.lt.s32.totalorder %s315_s17, 3 }
   0x5   : > { %p164_p2 = pnand %p293_p0, %p163_p1 }
   0x6   : > { %v202_v0 = vld [vmem:[%s369_s0] sm:$0xff] (!%p164_p2)  ;;  %v317_v1 = vmov (!%p164_p2), 0   ;;  %p189_p3 = scmp.lt.s32.totalorder (!%p164_p2), %s289_s18, 1  ;;  %s220_s23 = sld [smem:[#allocation2]] (!%p164_p2) }
   0x7   : > { %167 = sbr.rel (%p164_p2) target bundleno = 147 (0x93), region = 36  ;;  %308 = vset.pattern.permute.xlu0 (!%p164_p2), %v317_v1  ;;  %v211_v2 = vld [vmem:[%s370_s1] sm:$0xff] (!%p164_p2) }
   0x8   : > { %205 = vperm.xlu0 (!%p164_p2), %308, %v202_v0  }
   0xc   : > { %214 = vperm.xlu0 (!%p164_p2), %308, %v211_v2   ;;  %v224_v10 = vstv (!%p164_p2), %s220_s23 }
   0xe   : > { %s375_s18 = smov (!%p189_p3, %s289_s18), 1 }
   0xf   : > { %s298_s22 = smul.u32 24, %s375_s18 }
  0x11   : > { %s193_s26 = scalar_lea.vmem %s372_s3, %s298_s22  ;;  %s198_s29 = scalar_lea.vmem %s373_s4, %s298_s22 }
  0x12   : > { %v199_v4 = vld [vmem:[%s193_s26] sm:$0xff]  ;;  %v200_v5 = vld [vmem:[%s193_s26 + $0x8] sm:$0xff]  ;;  %v201_v6 = vld [vmem:[%s193_s26 + $0x10] sm:$0xff] }
  0x87   : > { %v206_v3 = vpop.permute.xlu0 %205 }
  0x88   : > { %v208_v7 = vmul.f32 %v206_v3, %v199_v4  ;;  %v209_v8 = vmul.f32 %v206_v3, %v200_v5  ;;  %v210_v9 = vmul.f32 %v206_v3, %v201_v6 }
  0x8b   : > { %v215_v11 = vpop.permute.xlu0 %214 }
  0x8c   : > { %v217_v12 = vadd.f32 %v215_v11, %v208_v7  ;;  %v218_v13 = vadd.f32 %v215_v11, %v209_v8  ;;  %v219_v14 = vadd.f32 %v215_v11, %v210_v9 }
  0x8e   : > { %vm221_vm0 = vcmp.ge.f32.partialorder %v217_v12, 0.0  ;;  %vm222_vm1 = vcmp.ge.f32.partialorder %v218_v13, 0.0  ;;  %vm223_vm2 = vcmp.ge.f32.partialorder %v219_v14, 0.0  ;;  %v225_v15 = vmul.f32 %v224_v10, %v217_v12 }
  0x8f   : > { %v226_v16 = vmul.f32 %v224_v10, %v218_v13  ;;  %v227_v17 = vmul.f32 %v224_v10, %v219_v14 }
  0x90   : > { %v228_v18 = vsel %vm221_vm0, %v217_v12, %v225_v15 }
  0x91   : > { %v229_v19 = vsel %vm222_vm1, %v218_v13, %v226_v16  ;;  %v230_v20 = vsel %vm223_vm2, %v219_v14, %v227_v17  ;;  %231 = vst [vmem:[%s198_s29] sm:$0xff] %v228_v18 }
  0x92   : > { %232 = vst [vmem:[%s198_s29 + $0x8] sm:$0xff] %v229_v19  ;;  %233 = vst [vmem:[%s198_s29 + $0x10] sm:$0xff] %v230_v20 }
  0x93 PF: > { %s15_s17 = sadd.s32 1, %s315_s17  }
  0x94   : > { %p12_p4 = scmp.ge.s32.totalorder %s15_s17, 4  }
  0x96   :  { %14 = sbr.rel (!%p12_p4) target bundleno = 2 (0x2), region = 66 }

// kernel: conv_block_forward.2
= control target key start
LH: loop header
LB: loop body
LE: loop exit
PB: predicated region body
PF: predicated region fallthrough
CT: control target
= control target key end

     0   :  { %s2019_s18 = smov 0   ;;  %s2188_s0 = inlined_call_operand.vmem [shape: f32[9,8,8], index: 0, kind: input, shape index: {}]   ;;  %s2189_s1 = inlined_call_operand.vmem [shape: f32[1,384], index: 1, kind: input, shape index: {}]   ;;  %s2190_s2 = inlined_call_operand.vmem [shape: f32[2,8,384], index: 2, kind: input, shape index: {}]   ;;  %s2191_s3 = inlined_call_operand.vmem [shape: f32[2,8,384], index: 3, kind: output, shape index: {0}]   ;;  %s2192_s4 = inlined_call_operand.vmem [shape: f32[2,8,1], index: 4, kind: output, shape index: {1}]   ;;  %s2193_s5 = inlined_call_operand.vmem [shape: f32[2,8,1], index: 5, kind: output, shape index: {2}]  }
   0x1 LB: > { %s1820_s19 = sadd.s32 4294967295, %s1977_s18   ;;  %p1824_p0 = scmp.ge.s32.totalorder %s1977_s18, 1  ;;  %s1977_s18 = sphi %s2019_s18, %s16_s18  }
   0x2   : > { %p192_p1 = scmp.lt.s32.totalorder %s1977_s18, 3 }
   0x4   : > { %p193_p2 = pnand %p1824_p0, %p192_p1 }
   0x5   : > { %p228_p3 = scmp.lt.s32.totalorder (!%p193_p2), %s1820_s19, 1  ;;  %v1979_v0 = vmov (!%p193_p2), 0.0   ;;  %vm1980_vm0 = vmmov (!%p193_p2), 0   ;;  %s1981_s24 = smov (!%p193_p2), 127   ;;  %v256_v4 = vlaneseq (!%p193_p2)  ;;  %v1829_v9 = vld [vmem:[%s2188_s0 + $0x8] sm:$0xff] (!%p193_p2)  ;;  %vm264_vm2 = vcmask (!%p193_p2), 64512  }
   0x6   : > { %196 = sbr.rel (%p193_p2) target bundleno = 568 (0x238), region = 32  ;;  %1875 = vmatprep.subr.mxu1 (!%p193_p2), %v1979_v0  ;;  %1877 = vmatprep.mubr.msk.f32.mxu1 (!%p193_p2), %vm1980_vm0, %v1979_v0  ;;  %s1982_s25 = smov (!%p193_p2), 126   ;;  %v249_v18 = vld [vmem:[%s2188_s0] sm:$0xff] (!%p193_p2)  ;;  %v1834_v25 = vld [vmem:[%s2188_s0 + $0x10] sm:$0xff] (!%p193_p2)  ;;  %v1837_v32 = vld [vmem:[%s2188_s0 + $0x18] sm:$0xff] (!%p193_p2)  ;;  %vm1693_vm10 = vcmask (!%p193_p2), 7168  }
   0x7   : > { %332 = vmatprep.mubr.f32.mxu0 (!%p193_p2), %v1979_v0  ;;  %s1983_s26 = smov (!%p193_p2), 110   ;;  %s1984_s27 = smov (!%p193_p2), 109   ;;  %v2040_v5 = vand.u32 (!%p193_p2), 127, %v256_v4  ;;  %v1840_v39 = vld [vmem:[%s2188_s0 + $0x20] sm:$0xff] (!%p193_p2)  ;;  %v1843_v46 = vld [vmem:[%s2188_s0 + $0x28] sm:$0xff] (!%p193_p2)  ;;  %v1846_v52 = vld [vmem:[%s2188_s0 + $0x30] sm:$0xff] (!%p193_p2) }
   0x8   : > { %s1985_s28 = smov (!%p193_p2), 108   ;;  %s1986_s29 = smov (!%p193_p2), 92   ;;  %v1849_v59 = vld [vmem:[%s2188_s0 + $0x38] sm:$0xff] (!%p193_p2)  ;;  %v1852_v62 = vld [vmem:[%s2188_s0 + $0x40] sm:$0xff] (!%p193_p2)  ;;  %v1672_v63 = vshrl.u32 (!%p193_p2), %v256_v4, 7 }
   0x9   : > { %s1987_s30 = smov (!%p193_p2), 91   ;;  %s1988_s6 = smov (!%p193_p2), 90   ;;  %vm258_vm1 = vcmp.lt.s32.totalorder (!%p193_p2), %v2040_v5, 127  ;;  %vm559_vm3 = vcmp.lt.s32.totalorder (!%p193_p2), %v2040_v5, 126  ;;  %vm718_vm4 = vcmp.lt.s32.totalorder (!%p193_p2), %v2040_v5, 110  ;;  %vm877_vm5 = vcmp.lt.s32.totalorder (!%p193_p2), %v2040_v5, 109 }
   0xa   : > { %vm1036_vm6 = vcmp.lt.s32.totalorder (!%p193_p2), %v2040_v5, 108  ;;  %vm1195_vm7 = vcmp.lt.s32.totalorder (!%p193_p2), %v2040_v5, 92  ;;  %vm1354_vm8 = vcmp.lt.s32.totalorder (!%p193_p2), %v2040_v5, 91  ;;  %vm1513_vm9 = vcmp.lt.s32.totalorder (!%p193_p2), %v2040_v5, 90 }
   0xb   : > { %v1677_v5 = vsub.s32 (!%p193_p2), 1, %v1672_v63 }
   0xd   : > { %s2195_s19 = smov (!%p228_p3, %s1820_s19), 1 }
   0xe   : > { %s1952_s20 = smul.u32 24, %s2195_s19 }
  0x10   : > { %s232_s23 = scalar_lea.vmem %s2190_s2, %s1952_s20  ;;  %s237_s7 = scalar_lea.vmem %s2191_s3, %s1952_s20 }
  0x11   : > { %v247_v1 = vld [vmem:[%s232_s23 + $0x8] sm:$0xff]  ;;  %v246_v2 = vld [vmem:[%s232_s23] sm:$0xff]  ;;  %v248_v3 = vld [vmem:[%s232_s23 + $0x10] sm:$0xff]  ;;  %s1827_s20 = sshll.u32 %s2195_s19, 3 }
  0x12   : > { %252 = vrot.lane.b32.xlu0 %v247_v1, %s1981_s24  ;;  %250 = vrot.lane.b32.xlu1 %v246_v2, %s1981_s24  ;;  %s241_s10 = scalar_lea.vmem %s2192_s4, %s1827_s20  ;;  %s245_s13 = scalar_lea.vmem %s2193_s5, %s1827_s20 }
  0x16   : > { %254 = vrot.lane.b32.xlu0 %v248_v3, %s1981_s24  ;;  %555 = vrot.lane.b32.xlu1 %v247_v1, %s1982_s25 }
  0x1a   : > { %557 = vrot.lane.b32.xlu0 %v248_v3, %s1982_s25  ;;  %553 = vrot.lane.b32.xlu1 %v246_v2, %s1982_s25 }
  0x1e   : > { %714 = vrot.lane.b32.xlu0 %v247_v1, %s1983_s26  ;;  %716 = vrot.lane.b32.xlu1 %v248_v3, %s1983_s26 }
  0x22   : > { %712 = vrot.lane.b32.xlu0 %v246_v2, %s1983_s26  ;;  %873 = vrot.lane.b32.xlu1 %v247_v1, %s1984_s27 }
  0x26   : > { %875 = vrot.lane.b32.xlu0 %v248_v3, %s1984_s27  ;;  %871 = vrot.lane.b32.xlu1 %v246_v2, %s1984_s27 }
  0x2a   : > { %1032 = vrot.lane.b32.xlu0 %v247_v1, %s1985_s28  ;;  %1034 = vrot.lane.b32.xlu1 %v248_v3, %s1985_s28 }
  0x2e   : > { %1030 = vrot.lane.b32.xlu0 %v246_v2, %s1985_s28  ;;  %1191 = vrot.lane.b32.xlu1 %v247_v1, %s1986_s29 }
  0x32   : > { %1193 = vrot.lane.b32.xlu0 %v248_v3, %s1986_s29  ;;  %1189 = vrot.lane.b32.xlu1 %v246_v2, %s1986_s29 }
  0x36   : > { %1350 = vrot.lane.b32.xlu0 %v247_v1, %s1987_s30  ;;  %1352 = vrot.lane.b32.xlu1 %v248_v3, %s1987_s30 }
  0x3a   : > { %1348 = vrot.lane.b32.xlu0 %v246_v2, %s1987_s30  ;;  %1509 = vrot.lane.b32.xlu1 %v247_v1, %s1988_s6 }
  0x3e   : > { %1511 = vrot.lane.b32.xlu0 %v248_v3, %s1988_s6  ;;  %1507 = vrot.lane.b32.xlu1 %v246_v2, %s1988_s6 }
  0x84   : > { %v253_v6 = vpop.permute.xlu0 %252  ;;  %v251_v7 = vpop.permute.xlu1 %250 }
  0x85   : > { %v260_v13 = vsel %vm258_vm1, %v251_v7, %v253_v6 }
  0x88   : > { %v255_v8 = vpop.permute.xlu0 %254  ;;  %v556_v10 = vpop.permute.xlu1 %555 }
  0x89   : > { %v259_v11 = vsel %vm258_vm1, %v253_v6, %v255_v8  ;;  %v261_v12 = vsel %vm258_vm1, %v255_v8, %v251_v7 }
  0x8a   : > { %268 = vmatprep.subr.mxu0 %v259_v11  ;;  %1876 = vmatpush3.msra.mxu1 %v261_v12 }
  0x8b   : > { %269 = vmatpush1.msra.mxu0 %v260_v13  ;;  %1878 = vmatmul.mubr.msk.f32.vlgmr.msra.gmra.mrb[0].mxu1 %vm264_vm2, %v1829_v9 }
  0x8c   : > { %1830 = vmatmul.mubr.msk.f32.vlgmr.msra.gmra.mrb[0].mxu0 %vm264_vm2, %v1829_v9  ;;  %412 = vmatprep.subr.mxu0 %v247_v1  ;;  %v558_v14 = vpop.permute.xlu0 %557  ;;  %v554_v15 = vpop.permute.xlu1 %553  ;;  %v1673_v1 = vsub.s32 0, %v1672_v63 }
  0x8d   : > { %413 = vmatpush1.msra.mxu0 %v246_v2  ;;  %1880 = vmatprep.subr.mxu1 %v1979_v0  ;;  %v560_v16 = vsel %vm559_vm3, %v556_v10, %v558_v14  ;;  %v562_v20 = vsel %vm559_vm3, %v558_v14, %v554_v15  ;;  %v561_v21 = vsel %vm559_vm3, %v554_v15, %v556_v10  ;;  %v1669_v2 = vld [vmem:[%s2189_s1] sm:$0x7] }
  0x8e   : > { %1881 = vmatpush3.msra.mxu1 %v248_v3  ;;  %568 = vmatprep.subr.mxu0 %v560_v16  ;;  %v1681_v3 = vsub.s32 2, %v1672_v63  ;;  %v1678_v7 = vrot.slane %v1669_v2, %v1677_v5 }
  0x8f   : > { %1882 = vmatprep.mubr.msk.f32.mxu1 %vm1980_vm0, %v1979_v0  ;;  %476 = vmatprep.mubr.f32.mxu0 %v1979_v0 }
  0x90   : > { %v715_v17 = vpop.permute.xlu0 %714  ;;  %1885 = vmatprep.subr.mxu1 %v1979_v0  ;;  %v717_v19 = vpop.permute.xlu1 %716  ;;  %v1682_v6 = vrot.slane %v1669_v2, %v1681_v3 }
  0x91   : > { %v719_v22 = vsel %vm718_vm4, %v715_v17, %v717_v19 }
  0x93   : > { %1883 = vmatmul.mubr.msk.f32.vlgmr.msra.gmra.mrb[0].mxu1 %vm264_vm2, %v249_v18 }
  0x94   : > { %1832 = vmatmul.mubr.msk.f32.vlgmr.msra.gmra.mrb[0].mxu0 %vm264_vm2, %v249_v18  ;;  %1886 = vmatpush3.msra.mxu1 %v562_v20  ;;  %v713_v23 = vpop.permute.xlu0 %712  ;;  %v874_v24 = vpop.permute.xlu1 %873 }
  0x95   : > { %569 = vmatpush1.msra.mxu0 %v561_v21  ;;  %1887 = vmatprep.mubr.msk.f32.mxu1 %vm1980_vm0, %v1979_v0  ;;  %v721_v27 = vsel %vm718_vm4, %v717_v19, %v713_v23  ;;  %v720_v28 = vsel %vm718_vm4, %v713_v23, %v715_v17 }
  0x96   : > { %727 = vmatprep.subr.mxu0 %v719_v22  ;;  %632 = vmatprep.mubr.f32.mxu0 %v1979_v0 }
  0x97   : > { %1890 = vmatprep.subr.mxu1 %v1979_v0 }
  0x98   : > { %v876_v26 = vpop.permute.xlu0 %875  ;;  %v872_v30 = vpop.permute.xlu1 %871 }
  0x99   : > { %v878_v29 = vsel %vm877_vm5, %v874_v24, %v876_v26  ;;  %v880_v34 = vsel %vm877_vm5, %v876_v26, %v872_v30  ;;  %v879_v35 = vsel %vm877_vm5, %v872_v30, %v874_v24 }
  0x9b   : > { %1888 = vmatmul.mubr.msk.f32.vlgmr.msra.gmra.mrb[0].mxu1 %vm264_vm2, %v1834_v25 }
  0x9c   : > { %1835 = vmatmul.mubr.msk.f32.vlgmr.msra.gmra.mrb[0].mxu0 %vm264_vm2, %v1834_v25  ;;  %1891 = vmatpush3.msra.mxu1 %v721_v27  ;;  %v1033_v31 = vpop.permute.xlu0 %1032  ;;  %v1035_v33 = vpop.permute.xlu1 %1034 }
  0x9d   : > { %728 = vmatpush1.msra.mxu0 %v720_v28  ;;  %1892 = vmatprep.mubr.msk.f32.mxu1 %vm1980_vm0, %v1979_v0  ;;  %v1037_v36 = vsel %vm1036_vm6, %v1033_v31, %v1035_v33 }
  0x9e   : > { %886 = vmatprep.subr.mxu0 %v878_v29  ;;  %791 = vmatprep.mubr.f32.mxu0 %v1979_v0 }
  0x9f   : > { %1895 = vmatprep.subr.mxu1 %v1979_v0 }
  0xa0   : > { %v1031_v37 = vpop.permute.xlu0 %1030  ;;  %v1192_v38 = vpop.permute.xlu1 %1191 }
  0xa1   : > { %v1039_v41 = vsel %vm1036_vm6, %v1035_v33, %v1031_v37  ;;  %v1038_v42 = vsel %vm1036_vm6, %v1031_v37, %v1033_v31 }
  0xa3   : > { %1893 = vmatmul.mubr.msk.f32.vlgmr.msra.gmra.mrb[0].mxu1 %vm264_vm2, %v1837_v32 }
  0xa4   : > { %1838 = vmatmul.mubr.msk.f32.vlgmr.msra.gmra.mrb[0].mxu0 %vm264_vm2, %v1837_v32  ;;  %1896 = vmatpush3.msra.mxu1 %v880_v34  ;;  %v1194_v40 = vpop.permute.xlu0 %1193  ;;  %v1190_v44 = vpop.permute.xlu1 %1189 }
  0xa5   : > { %887 = vmatpush1.msra.mxu0 %v879_v35  ;;  %1897 = vmatprep.mubr.msk.f32.mxu1 %vm1980_vm0, %v1979_v0  ;;  %v1196_v43 = vsel %vm1195_vm7, %v1192_v38, %v1194_v40  ;;  %v1198_v48 = vsel %vm1195_vm7, %v1194_v40, %v1190_v44  ;;  %v1197_v49 = vsel %vm1195_vm7, %v1190_v44, %v1192_v38 }
  0xa6   : > { %1045 = vmatprep.subr.mxu0 %v1037_v36  ;;  %950 = vmatprep.mubr.f32.mxu0 %v1979_v0 }
  0xa7   : > { %1900 = vmatprep.subr.mxu1 %v1979_v0 }
  0xa8   : > { %v1351_v45 = vpop.permute.xlu0 %1350  ;;  %v1353_v47 = vpop.permute.xlu1 %1352 }
  0xa9   : > { %v1355_v50 = vsel %vm1354_vm8, %v1351_v45, %v1353_v47 }
  0xab   : > { %1898 = vmatmul.mubr.msk.f32.vlgmr.msra.gmra.mrb[0].mxu1 %vm264_vm2, %v1840_v39 }
  0xac   : > { %1841 = vmatmul.mubr.msk.f32.vlgmr.msra.gmra.mrb[0].mxu0 %vm264_vm2, %v1840_v39  ;;  %1901 = vmatpush3.msra.mxu1 %v1039_v41  ;;  %v1349_v51 = vpop.permute.xlu0 %1348  ;;  %v1510_v55 = vpop.permute.xlu1 %1509 }
  0xad   : > { %1046 = vmatpush1.msra.mxu0 %v1038_v42  ;;  %1902 = vmatprep.mubr.msk.f32.mxu1 %vm1980_vm0, %v1979_v0  ;;  %v1357_v54 = vsel %vm1354_vm8, %v1353_v47, %v1349_v51  ;;  %v1356_v56 = vsel %vm1354_vm8, %v1349_v51, %v1351_v45 }
  0xae   : > { %1204 = vmatprep.subr.mxu0 %v1196_v43  ;;  %1109 = vmatprep.mubr.f32.mxu0 %v1979_v0 }
  0xaf   : > { %1905 = vmatprep.subr.mxu1 %v1979_v0 }
  0xb0   : > { %v1512_v53 = vpop.permute.xlu0 %1511  ;;  %v1508_v58 = vpop.permute.xlu1 %1507 }
  0xb1   : > { %v1514_v57 = vsel %vm1513_vm9, %v1510_v55, %v1512_v53  ;;  %v1516_v60 = vsel %vm1513_vm9, %v1512_v53, %v1508_v58  ;;  %v1515_v61 = vsel %vm1513_vm9, %v1508_v58, %v1510_v55 }
  0xb3   : > { %1903 = vmatmul.mubr.msk.f32.vlgmr.msra.gmra.mrb[0].mxu1 %vm264_vm2, %v1843_v46 }
  0xb4   : > { %1844 = vmatmul.mubr.msk.f32.vlgmr.msra.gmra.mrb[0].mxu0 %vm264_vm2, %v1843_v46  ;;  %1906 = vmatpush3.msra.mxu1 %v1198_v48 }
  0xb5   : > { %1205 = vmatpush1.msra.mxu0 %v1197_v49  ;;  %1907 = vmatprep.mubr.msk.f32.mxu1 %vm1980_vm0, %v1979_v0 }
  0xb6   : > { %1363 = vmatprep.subr.mxu0 %v1355_v50  ;;  %1268 = vmatprep.mubr.f32.mxu0 %v1979_v0 }
  0xb7   : > { %1910 = vmatprep.subr.mxu1 %v1979_v0 }
  0xbb   : > { %1908 = vmatmul.mubr.msk.f32.vlgmr.msra.gmra.mrb[0].mxu1 %vm264_vm2, %v1846_v52 }
  0xbc   : > { %1847 = vmatmul.mubr.msk.f32.vlgmr.msra.gmra.mrb[0].mxu0 %vm264_vm2, %v1846_v52  ;;  %1911 = vmatpush3.msra.mxu1 %v1357_v54 }
  0xbd   : > { %1364 = vmatpush1.msra.mxu0 %v1356_v56  ;;  %1912 = vmatprep.mubr.msk.f32.mxu1 %vm1980_vm0, %v1979_v0 }
  0xbe   : > { %1522 = vmatprep.subr.mxu0 %v1514_v57  ;;  %1427 = vmatprep.mubr.f32.mxu0 %v1979_v0 }
  0xbf   : > { %1915 = vmatprep.subr.mxu1 %v1979_v0 }
  0xc3   : > { %1913 = vmatmul.mubr.msk.f32.vlgmr.msra.gmra.mrb[0].mxu1 %vm264_vm2, %v1849_v59 }
  0xc4   : > { %1850 = vmatmul.mubr.msk.f32.vlgmr.msra.gmra.mrb[0].mxu0 %vm264_vm2, %v1849_v59  ;;  %1916 = vmatpush3.msra.mxu1 %v1516_v60 }
  0xc5   : > { %1523 = vmatpush1.msra.mxu0 %v1515_v61  ;;  %1917 = vmatprep.mubr.msk.f32.mxu1 %vm1980_vm0, %v1979_v0 }
  0xc6   : > { %1586 = vmatprep.mubr.f32.mxu0 %v1979_v0  ;;  %v1674_v0 = vrot.slane %v1669_v2, %v1673_v1 }
  0xcb   : > { %1918 = vmatmul.mubr.msk.f32.vlgmr.msra.gmra.mrb[0].mxu1 %vm264_vm2, %v1852_v62 }
  0xcc   : > { %1853 = vmatmul.mubr.msk.f32.vlgmr.msra.gmra.mrb[0].mxu0 %vm264_vm2, %v1852_v62 }
 0x19e   : > { %v1659_v8 = vpop.f32.mrb[0].mxu1 }
 0x19f   : > { %1668 = vst [vmem:[%s237_s7 + $0x10] sm:$0xff] %v1659_v8  ;;  %v1588_v9 = vpop.f32.mrb[0].mxu0  ;;  %v1919_v10 = vpop.f32.mrb[1].mxu1  ;;  %v1688_v12 = vmul.f32 %v1682_v6, %v1659_v8 }
 0x1a0   : > { %1666 = vst [vmem:[%s237_s7] sm:$0xff] %v1588_v9  ;;  %v1686_v4 = vmul.f32 %v1674_v0, %v1588_v9  ;;  %v1590_v11 = vpop.f32.mrb[1].mxu0 }
 0x1a1   : > { %1667 = vst [vmem:[%s237_s7 + $0x8] sm:$0xff] %v1590_v11  ;;  %v1687_v13 = vmul.f32 %v1678_v7, %v1590_v11  ;;  %v1697_v18 = vmul.f32 %v1688_v12, %v1688_v12 }
 0x1a2   : > { %v1695_v14 = vmul.f32 %v1686_v4, %v1686_v4 }
 0x1a3   : > { %v1689_v15 = vadd.f32 %v1687_v13, %v1686_v4  ;;  %v1696_v16 = vmul.f32 %v1687_v13, %v1687_v13 }
 0x1a5   : > { %v1690_v17 = vadd.f32 %v1689_v15, %v1688_v12  ;;  %v1698_v19 = vadd.f32 %v1696_v16, %v1695_v14 }
 0x1a7   : > { %1691 = vadd.xlane.f32.xlu0 %v1690_v17  ;;  %v1699_v20 = vadd.f32 %v1698_v19, %v1697_v18 }
 0x1a9   : > { %1700 = vadd.xlane.f32.xlu1 %v1699_v20 }
 0x234   : > { %v1692_v21 = vpop.xlane.xlu0 %1691 }
 0x235   : > { %1694 = vst.msk [vmem:[%s241_s10] sm:$0xff] %vm1693_vm10, %v1692_v21 }
 0x236   : > { %v1701_v22 = vpop.xlane.xlu1 %1700 }
 0x237   : > { %1702 = vst.msk [vmem:[%s245_s13] sm:$0xff] %vm1693_vm10, %v1701_v22 }
 0x238 PF: > { %s16_s18 = sadd.s32 1, %s1977_s18  }
 0x239   : > { %p13_p4 = scmp.ge.s32.totalorder %s16_s18, 4  }
 0x23b   :  { %15 = sbr.rel (!%p13_p4) target bundleno = 1 (0x1), region = 94 }

</bundles_post_ra>
